<compile_context>
chip_gen: v5e
topology: v5e:2x2
jax: 0.10.0
libtpu: 0.0.40
codegen_flags: <defaults>
</compile_context>

<pallas_src>
import functools

import jax
import jax.numpy as jnp
from jax import lax
from jax.experimental import pallas as pl
from jax.experimental.pallas import tpu as pltpu


def _round_up(x, m):
    return ((x + m - 1) // m) * m


def _vmem_budget_bytes():
    """Generation-aware usable VMEM budget (capacity minus headroom)."""
    cap = 64 << 20
    try:
        info = pltpu.get_tpu_info()
        cap = int(getattr(info, "vmem_capacity_bytes", cap))
    except Exception:
        pass
    return max(cap - (16 << 20), 32 << 20)


def _resident_vmem_estimate(tm, n_pad, d):
    feats = n_pad * d * 2          # resident bf16 contrast (single buffered)
    col_lab = n_pad * 4            # resident int32 column labels
    temps = 6 * tm * n_pad * 4     # live [TM, N] f32/int temporaries
    small = 2 * 3 * tm * 4         # double-buffered row labels / counts / out
    return feats + col_lab + temps + small


def _streaming_vmem_estimate(tm, tn, d):
    feats = 2 * tm * d * 2 + 2 * tn * d * 2   # double-buffered bf16 tiles
    labels = 2 * 2 * tm * 4 + 2 * tn * 4
    temps = 6 * tm * tn * 4                   # live [TM, TN] temporaries
    scratch = 5 * tm * 4
    return feats + labels + temps + scratch


# --------------------------------------------------------------------------
# Kernel 1: contrast features fully resident in VMEM (v5e / v6e default).
# --------------------------------------------------------------------------
def _supcon_resident_kernel(contrast_ref, row_lab_ref, col_lab_ref, pos_cnt_ref,
                            loss_ref, *, inv_temperature, scale, n_valid):
    # contrast_ref: [N_pad, D] bf16 (resident), row_lab_ref: [TM, 1] int32,
    # col_lab_ref: [1, N_pad] int32, pos_cnt_ref / loss_ref: [TM, 1] f32.
    tm = loss_ref.shape[0]
    n_pad = contrast_ref.shape[0]
    i = pl.program_id(0)

    # Anchor rows are sliced out of the resident contrast buffer (features are
    # read from HBM only once) and pre-scaled by 1/T -> O(TM*D), not O(TM*N).
    row_start = pl.multiple_of(i * tm, tm)
    anchor = contrast_ref[pl.ds(row_start, tm), :] * inv_temperature

    # NT bf16 matmul, f32 accumulation: [TM, N_pad] logits (already / T).
    logits = lax.dot_general(
        anchor, contrast_ref[...],
        dimension_numbers=(((1,), (1,)), ((), ())),
        preferred_element_type=jnp.float32)

    # Self / pad masks rebuilt from a single [TM, N] iota.
    row_id = i * tm + lax.broadcasted_iota(jnp.int32, (tm, 1), 0)
    col_id = lax.broadcasted_iota(jnp.int32, (tm, n_pad), 1)
    is_self = col_id == row_id
    if n_valid == n_pad:
        excluded = is_self
    else:
        excluded = jnp.logical_or(is_self, col_id >= n_valid)
    same_class = row_lab_ref[...] == col_lab_ref[...]
    pos_mask = jnp.logical_and(same_class, jnp.logical_not(excluded))

    # Stable masked log-sum-exp; positives are accumulated on the shifted
    # logits so no [TM, N] log_prob array is ever materialized.
    row_max = jnp.max(logits, axis=1, keepdims=True)
    shifted = logits - row_max
    exp_l = jnp.where(excluded, 0.0, jnp.exp(shifted))
    log_denom = jnp.log(jnp.sum(exp_l, axis=1, keepdims=True))
    pos_sum = jnp.sum(jnp.where(pos_mask, shifted, 0.0), axis=1, keepdims=True)

    pos_cnt = pos_cnt_ref[...]
    # max(., 1) guards zero-positive anchors (PyTorch would emit NaN there).
    loss_ref[...] = (scale * (pos_sum - pos_cnt * log_denom)
                     / jnp.maximum(pos_cnt, 1.0))


# --------------------------------------------------------------------------
# Kernel 2: flash-style streaming over contrast column tiles (v7x / large N).
# --------------------------------------------------------------------------
def _supcon_streaming_kernel(anchor_ref, contrast_ref, row_lab_ref, col_lab_ref,
                             pos_cnt_ref, loss_ref, m_sc, l_sc, ps_sc,
                             *, inv_temperature, scale, n_valid, n_padded):
    tm = anchor_ref.shape[0]
    tn = contrast_ref.shape[0]
    i = pl.program_id(0)
    j = pl.program_id(1)

    @pl.when(j == 0)
    def _():
        m_sc[...] = jnp.full_like(m_sc, -jnp.inf)
        l_sc[...] = jnp.zeros_like(l_sc)
        ps_sc[...] = jnp.zeros_like(ps_sc)

    anchor = anchor_ref[...] * inv_temperature          # 1/T folded, O(TM*D)
    s = lax.dot_general(
        anchor, contrast_ref[...],
        dimension_numbers=(((1,), (1,)), ((), ())),
        preferred_element_type=jnp.float32)             # [TM, TN] f32

    row_id = i * tm + lax.broadcasted_iota(jnp.int32, (tm, 1), 0)
    col_id = j * tn + lax.broadcasted_iota(jnp.int32, (tm, tn), 1)
    # TODO(synk): pl.when-skip the self mask on column tiles that cannot hold
    # the diagonal; kept unconditional for simplicity (small VPU cost).
    is_self = col_id == row_id
    if n_valid == n_padded:
        excluded = is_self
    else:
        excluded = jnp.logical_or(is_self, col_id >= n_valid)
    same_class = row_lab_ref[...] == col_lab_ref[...]
    pos_mask = jnp.logical_and(same_class, jnp.logical_not(excluded))

    # Online (flash) logsumexp + positive-logit accumulation.
    m_prev = m_sc[...]
    m_new = jnp.maximum(m_prev, jnp.max(s, axis=1, keepdims=True))
    alpha = jnp.exp(m_prev - m_new)
    exp_s = jnp.where(excluded, 0.0, jnp.exp(s - m_new))
    l_sc[...] = alpha * l_sc[...] + jnp.sum(exp_s, axis=1, keepdims=True)
    ps_sc[...] = ps_sc[...] + jnp.sum(jnp.where(pos_mask, s, 0.0), axis=1,
                                      keepdims=True)
    m_sc[...] = m_new

    @pl.when(j == pl.num_programs(1) - 1)
    def _():
        pos_cnt = pos_cnt_ref[...]
        lse = m_sc[...] + jnp.log(l_sc[...])
        loss_ref[...] = (scale * (ps_sc[...] - pos_cnt * lse)
                         / jnp.maximum(pos_cnt, 1.0))


# --------------------------------------------------------------------------
# pallas_call wrappers.
# --------------------------------------------------------------------------
def _run_resident(contrast, row_labels, col_labels, pos_cnt, *, tm, n_pad, dim,
                  inv_temperature, scale, n_valid, vmem_limit):
    kernel = functools.partial(_supcon_resident_kernel,
                               inv_temperature=inv_temperature, scale=scale,
                               n_valid=n_valid)
    grid = (n_pad // tm,)

    def call(single_buffer):
        if single_buffer:
            # Constant-index resident inputs: one VMEM buffer is enough.
            contrast_spec = pl.BlockSpec((n_pad, dim), lambda i: (0, 0),
                                         pipeline_mode=pl.Buffered(1))
            col_spec = pl.BlockSpec((1, n_pad), lambda i: (0, 0),
                                    pipeline_mode=pl.Buffered(1))
        else:
            contrast_spec = pl.BlockSpec((n_pad, dim), lambda i: (0, 0))
            col_spec = pl.BlockSpec((1, n_pad), lambda i: (0, 0))
        return pl.pallas_call(
            kernel,
            out_shape=jax.ShapeDtypeStruct((n_pad, 1), jnp.float32),
            grid_spec=pltpu.PrefetchScalarGridSpec(
                num_scalar_prefetch=0,
                grid=grid,
                in_specs=[
                    contrast_spec,                                # features
                    pl.BlockSpec((tm, 1), lambda i: (i, 0)),      # row labels
                    col_spec,                                     # col labels
                    pl.BlockSpec((tm, 1), lambda i: (i, 0)),      # pos counts
                ],
                out_specs=pl.BlockSpec((tm, 1), lambda i: (i, 0)),
            ),
            compiler_params=pltpu.CompilerParams(
                dimension_semantics=("parallel",),
                vmem_limit_bytes=vmem_limit),
        )(contrast, row_labels, col_labels, pos_cnt)

    try:
        return call(True)
    except Exception:
        # pl.Buffered(1) single-buffering not supported on this JAX/Mosaic
        # version -> fall back to default buffering (correctness unchanged).
        return call(False)


def _run_streaming(contrast, row_labels, col_labels, pos_cnt, *, tm, tn, n_pad,
                   dim, inv_temperature, scale, n_valid, vmem_limit):
    kernel = functools.partial(_supcon_streaming_kernel,
                               inv_temperature=inv_temperature, scale=scale,
                               n_valid=n_valid, n_padded=n_pad)
    grid = (n_pad // tm, n_pad // tn)
    return pl.pallas_call(
        kernel,
        out_shape=jax.ShapeDtypeStruct((n_pad, 1), jnp.float32),
        grid_spec=pltpu.PrefetchScalarGridSpec(
            num_scalar_prefetch=0,
            grid=grid,
            in_specs=[
                pl.BlockSpec((tm, dim), lambda i, j: (i, 0)),   # anchor rows
                pl.BlockSpec((tn, dim), lambda i, j: (j, 0)),   # contrast tile
                pl.BlockSpec((tm, 1), lambda i, j: (i, 0)),     # row labels
                pl.BlockSpec((1, tn), lambda i, j: (0, j)),     # col labels
                pl.BlockSpec((tm, 1), lambda i, j: (i, 0)),     # pos counts
            ],
            out_specs=pl.BlockSpec((tm, 1), lambda i, j: (i, 0)),
            scratch_shapes=[pltpu.VMEM((tm, 1), jnp.float32),   # running max
                            pltpu.VMEM((tm, 1), jnp.float32),   # running denom
                            pltpu.VMEM((tm, 1), jnp.float32)],  # running Σpos
        ),
        compiler_params=pltpu.CompilerParams(
            dimension_semantics=("parallel", "arbitrary"),
            vmem_limit_bytes=vmem_limit),
    )(contrast, contrast, row_labels, col_labels, pos_cnt)


def sup_con_loss(features, labels=None, mask=None, temperature=0.07,
                 contrast_mode='all', base_temperature=0.07,
                 force_streaming=False):
    """JAX/Pallas equivalent of SupConLoss.forward (contrast_mode='all')."""
    if features.ndim < 3:
        raise ValueError('`features` needs to be [bsz, n_views, ...]')
    if features.ndim > 3:
        features = features.reshape(features.shape[0], features.shape[1], -1)
    if contrast_mode != 'all':
        # TODO(synk): contrast_mode='one' (single-view anchors) not implemented.
        raise ValueError('Only contrast_mode="all" is implemented')

    bsz, n_views, dim = features.shape
    n_total = bsz * n_views

    if labels is not None and mask is not None:
        raise ValueError('Cannot define both `labels` and `mask`')
    if mask is not None:
        # TODO(synk): explicit (possibly asymmetric) [bsz, bsz] masks need a
        # mask-tile kernel variant; only the labels / SimCLR paths are wired up.
        raise NotImplementedError('explicit `mask` not supported by the Pallas path')
    if labels is None:
        # SimCLR degenerate case: each sample is its own class (eye mask).
        labels = jnp.arange(bsz, dtype=jnp.int32)
    else:
        labels = jnp.asarray(labels).reshape(-1)
        if labels.shape[0] != bsz:
            raise ValueError('Num of labels does not match num of features')
        labels = labels.astype(jnp.int32)

    # contrast_feature = cat(unbind(features, dim=1), dim=0): view-major stack,
    # bf16 MXU inputs with f32 accumulation in the kernel.
    contrast = jnp.transpose(features, (1, 0, 2)).reshape(n_total, dim)
    contrast = contrast.astype(jnp.bfloat16)

    labels_full = jnp.tile(labels, n_views)                               # [N]
    # positives per anchor = n_views * (#same-class in batch) - 1 (self);
    # tiny [bsz, bsz] hoisted to the wrapper instead of an N^2 kernel reduce.
    per_sample = jnp.sum(labels[:, None] == labels[None, :], axis=1)
    pos_cnt_full = jnp.tile(n_views * per_sample - 1, n_views).astype(jnp.float32)

    budget = _vmem_budget_bytes()
    small_vmem = budget < (80 << 20)          # v7x-class (64 MiB) TensorCore

    # ---- Resident-path tile selection (v7x caps TM at 128) -----------------
    tm_cap = 128 if small_vmem else 512
    tm_cap = min(tm_cap, _round_up(n_total, 8))
    resident_tm = None
    for cand in (512, 384, 256, 128, 64, 32, 16, 8):
        if cand > tm_cap:
            continue
        if _resident_vmem_estimate(cand, _round_up(n_total, cand), dim) <= budget:
            resident_tm = cand
            break

    use_streaming = (bool(force_streaming) or resident_tm is None
                     or (resident_tm < 64 <= tm_cap))

    if use_streaming:
        # ---- Streaming (flash-style) path ----------------------------------
        n128 = _round_up(n_total, 128)
        tn = 128
        for cand in (512, 256):
            if cand <= max(128, n128 // 2):
                tn = cand
                break
        tm = 128 if small_vmem else 256
        while _streaming_vmem_estimate(tm, tn, dim) > budget and tn > 128:
            tn //= 2
        while _streaming_vmem_estimate(tm, tn, dim) > budget and tm > 8:
            tm //= 2
        n_pad = _round_up(n_total, max(tm, tn))   # tm, tn are powers of two
    else:
        tm = resident_tm
        n_pad = _round_up(n_total, tm)
        tiles = n_pad // tm
        # Even number of row tiles load-balances the "parallel" axis across
        # v7x's two TensorCores; harmless on single-core chips.
        if tiles > 1 and tiles % 2 == 1 and tm >= 32:
            tm //= 2
            n_pad = _round_up(n_total, tm)

    if n_pad > n_total:
        pad = n_pad - n_total
        contrast = jnp.pad(contrast, ((0, pad), (0, 0)))
        labels_full = jnp.pad(labels_full, (0, pad), constant_values=-1)
        pos_cnt_full = jnp.pad(pos_cnt_full, (0, pad))

    row_labels = labels_full.reshape(n_pad, 1)
    col_labels = labels_full.reshape(1, n_pad)
    pos_cnt = pos_cnt_full.reshape(n_pad, 1)

    inv_temperature = float(1.0 / temperature)
    scale = -(float(temperature) / float(base_temperature))

    if use_streaming:
        per_anchor = _run_streaming(
            contrast, row_labels, col_labels, pos_cnt, tm=tm, tn=tn,
            n_pad=n_pad, dim=dim, inv_temperature=inv_temperature, scale=scale,
            n_valid=n_total, vmem_limit=budget)
    else:
        per_anchor = _run_resident(
            contrast, row_labels, col_labels, pos_cnt, tm=tm, n_pad=n_pad,
            dim=dim, inv_temperature=inv_temperature, scale=scale,
            n_valid=n_total, vmem_limit=budget)

    # loss.view(anchor_count, batch_size).mean() == mean over all real anchors;
    # padded anchors are sliced off (never multiplied in, so no NaN leakage).
    return jnp.mean(per_anchor[:n_total, 0])


def _reference_loss(features, labels, temperature=0.07, base_temperature=0.07,
                    match_kernel_precision=False):
    """Pure-JAX reference mirroring the PyTorch forward, for validation."""
    bsz, n_views, dim = features.shape
    n = bsz * n_views
    labels = labels.reshape(-1, 1)
    mask = (labels == labels.T).astype(jnp.float32)
    contrast = jnp.transpose(features, (1, 0, 2)).reshape(n, dim)
    if match_kernel_precision:
        # Same arithmetic as the kernel: bf16 features, 1/T folded into the
        # (bf16) anchor before the MXU, f32 accumulation.
        c = contrast.astype(jnp.bfloat16)
        a = c * (1.0 / temperature)
        adc = jnp.dot(a, c.T, preferred_element_type=jnp.float32)
    else:
        adc = jnp.dot(contrast, contrast.T) / temperature
    logits = adc - jnp.max(adc, axis=1, keepdims=True)
    mask = jnp.tile(mask, (n_views, n_views))
    logits_mask = 1.0 - jnp.eye(n, dtype=jnp.float32)
    mask = mask * logits_mask
    exp_logits = jnp.exp(logits) * logits_mask
    log_prob = logits - jnp.log(exp_logits.sum(1, keepdims=True))
    mean_log_prob_pos = (mask * log_prob).sum(1) / mask.sum(1)
    loss = -(temperature / base_temperature) * mean_log_prob_pos
    return loss.reshape(n_views, bsz).mean()


if __name__ == "__main__":
    key = jax.random.PRNGKey(0)
    k1, k2, k3, k4, k5, k6 = jax.random.split(key, 6)

    def make_inputs(kf, kl, bsz, n_views, dim, n_classes):
        feats = jax.random.normal(kf, (bsz, n_views, dim), dtype=jnp.float32)
        # L2-normalize like a typical SupCon embedding.
        feats = feats / jnp.linalg.norm(feats, axis=-1, keepdims=True)
        labels = jax.random.randint(kl, (bsz,), 0, n_classes)
        return feats, labels

    cases = []

    # A) small problem: resident path, single row tile, no padding.
    feats_a, labels_a = make_inputs(k1, k2, 8, 2, 32, 4)
    loss_a = jax.block_until_ready(sup_con_loss(feats_a, labels=labels_a))
    cases.append((loss_a, feats_a, labels_a))

    # B) resident path with row padding (n_total=40 -> padded) and >1 row tile.
    feats_b, labels_b = make_inputs(k3, k4, 20, 2, 32, 5)
    loss_b = jax.block_until_ready(sup_con_loss(feats_b, labels=labels_b))
    cases.append((loss_b, feats_b, labels_b))

    # C) forced streaming (flash-style) path: padding + multi-column-tile grid.
    feats_c, labels_c = make_inputs(k5, k6, 72, 2, 32, 6)
    loss_c = jax.block_until_ready(
        sup_con_loss(feats_c, labels=labels_c, force_streaming=True))
    cases.append((loss_c, feats_c, labels_c))

    for loss, feats, labels in cases:
        # Matched-precision reference (bf16 matmul + bf16-pre-scaled anchor).
        ref_matched = _reference_loss(feats, labels, match_kernel_precision=True)
        # Full-f32 reference: loose check (bf16 MXU inputs cost some precision).
        ref_f32 = _reference_loss(feats, labels, match_kernel_precision=False)
        assert bool(jnp.isfinite(loss)), loss
        assert jnp.allclose(loss, ref_matched, rtol=2e-3, atol=2e-3), (loss, ref_matched)
        assert jnp.allclose(loss, ref_f32, rtol=5e-2, atol=5e-2), (loss, ref_f32)

    print("KERNEL_OK")
</pallas_src>

<mosaic_0001>
module attributes {stable_mosaic.version = 11 : i64} {
  func.func @_supcon_resident_kernel(%arg0: i32, %arg1: memref<16x32xbf16, #tpu.memory_space<vmem>>, %arg2: memref<16x1xi32, #tpu.memory_space<vmem>>, %arg3: memref<1x16xi32, #tpu.memory_space<vmem>>, %arg4: memref<16x1xf32, #tpu.memory_space<vmem>>, %arg5: memref<16x1xf32, #tpu.memory_space<vmem>>) attributes {dimension_semantics = [#tpu.dimension_semantics<parallel>], iteration_bounds = array<i64: 1>, scalar_prefetch = 0 : i64, scratch_operands = 0 : i64, tpu.core_type = #tpu.core_type<tc>, window_params = [{pipeline_mode = #tpu.pipeline_mode<synchronous>, transform_indices = @transform_0, window_bounds = array<i64: 16, 32>}, {transform_indices = @transform_1, window_bounds = array<i64: 16, 1>}, {pipeline_mode = #tpu.pipeline_mode<synchronous>, transform_indices = @transform_2, window_bounds = array<i64: 1, 16>}, {transform_indices = @transform_3, window_bounds = array<i64: 16, 1>}, {transform_indices = @transform_4, window_bounds = array<i64: 16, 1>}]} {
    %c16_i32 = arith.constant 16 : i32
    %0 = arith.muli %arg0, %c16_i32 : i32
    %1 = tpu.assume_multiple %0, 16 : i32
    %2 = arith.index_cast %1 : i32 to index
    %c0 = arith.constant 0 : index
    %3 = vector.load %arg1[%2, %c0] : memref<16x32xbf16, #tpu.memory_space<vmem>>, vector<16x32xbf16>
    %cst = arith.constant 1.431250e+01 : bf16
    %4 = vector.broadcast %cst : bf16 to vector<16x32xbf16>
    %5 = arith.mulf %3, %4 : vector<16x32xbf16>
    %c0_0 = arith.constant 0 : index
    %c0_1 = arith.constant 0 : index
    %6 = vector.load %arg1[%c0_0, %c0_1] : memref<16x32xbf16, #tpu.memory_space<vmem>>, vector<16x32xbf16>
    %cst_2 = arith.constant dense<0.000000e+00> : vector<16x16xf32>
    %7 = tpu.matmul %5, %6, %cst_2 {dimension_numbers = #tpu.dot_dimension_numbers<[1], [1], [0], [0], [0, 0, 1, 0], [], []>} : vector<16x32xbf16>, vector<16x32xbf16>, vector<16x16xf32> -> vector<16x16xf32>
    %c16_i32_3 = arith.constant 16 : i32
    %8 = arith.muli %arg0, %c16_i32_3 : i32
    %9 = tpu.iota {dimensions = array<i32: 0>} : vector<16x1xi32>
    %10 = vector.broadcast %8 : i32 to vector<16x1xi32>
    %11 = arith.addi %10, %9 : vector<16x1xi32>
    %12 = tpu.iota {dimensions = array<i32: 1>} : vector<16x16xi32>
    %13 = vector.broadcast %11 : vector<16x1xi32> to vector<16x16xi32>
    %14 = arith.cmpi eq, %12, %13 : vector<16x16xi32>
    %c0_4 = arith.constant 0 : index
    %c0_5 = arith.constant 0 : index
    %15 = vector.load %arg2[%c0_4, %c0_5] : memref<16x1xi32, #tpu.memory_space<vmem>>, vector<16x1xi32>
    %c0_6 = arith.constant 0 : index
    %c0_7 = arith.constant 0 : index
    %16 = vector.load %arg3[%c0_6, %c0_7] : memref<1x16xi32, #tpu.memory_space<vmem>>, vector<1x16xi32>
    %17 = vector.broadcast %15 : vector<16x1xi32> to vector<16x16xi32>
    %18 = vector.broadcast %16 : vector<1x16xi32> to vector<16x16xi32>
    %19 = arith.cmpi eq, %17, %18 : vector<16x16xi32>
    %cst_8 = arith.constant dense<true> : vector<16x16xi1>
    %20 = arith.xori %14, %cst_8 : vector<16x16xi1>
    %21 = arith.andi %19, %20 : vector<16x16xi1>
    %cst_9 = arith.constant dense<0xFF800000> : vector<16xf32>
    %22 = vector.multi_reduction <maximumf>, %7, %cst_9 [1] : vector<16x16xf32> to vector<16xf32>
    %23 = vector.shape_cast %22 : vector<16xf32> to vector<16x1xf32>
    %24 = vector.broadcast %23 : vector<16x1xf32> to vector<16x16xf32>
    %25 = arith.subf %7, %24 : vector<16x16xf32>
    %26 = math.exp %25 : vector<16x16xf32>
    %cst_10 = arith.constant 0.000000e+00 : f32
    %27 = vector.broadcast %cst_10 : f32 to vector<16x16xf32>
    %28 = arith.select %14, %27, %26 : vector<16x16xi1>, vector<16x16xf32>
    %cst_11 = arith.constant dense<0.000000e+00> : vector<16xf32>
    %29 = vector.multi_reduction <add>, %28, %cst_11 [1] : vector<16x16xf32> to vector<16xf32>
    %30 = vector.shape_cast %29 : vector<16xf32> to vector<16x1xf32>
    %31 = math.log %30 : vector<16x1xf32>
    %cst_12 = arith.constant 0.000000e+00 : f32
    %32 = vector.broadcast %cst_12 : f32 to vector<16x16xf32>
    %33 = arith.select %21, %25, %32 : vector<16x16xi1>, vector<16x16xf32>
    %cst_13 = arith.constant dense<0.000000e+00> : vector<16xf32>
    %34 = vector.multi_reduction <add>, %33, %cst_13 [1] : vector<16x16xf32> to vector<16xf32>
    %35 = vector.shape_cast %34 : vector<16xf32> to vector<16x1xf32>
    %c0_14 = arith.constant 0 : index
    %c0_15 = arith.constant 0 : index
    %36 = vector.load %arg4[%c0_14, %c0_15] : memref<16x1xf32, #tpu.memory_space<vmem>>, vector<16x1xf32>
    %37 = arith.mulf %36, %31 : vector<16x1xf32>
    %38 = arith.subf %35, %37 : vector<16x1xf32>
    %cst_16 = arith.constant -1.000000e+00 : f32
    %39 = vector.broadcast %cst_16 : f32 to vector<16x1xf32>
    %40 = arith.mulf %39, %38 : vector<16x1xf32>
    %cst_17 = arith.constant 1.000000e+00 : f32
    %41 = vector.broadcast %cst_17 : f32 to vector<16x1xf32>
    %42 = arith.maximumf %36, %41 : vector<16x1xf32>
    %43 = arith.divf %40, %42 : vector<16x1xf32>
    %c0_18 = arith.constant 0 : index
    %c0_19 = arith.constant 0 : index
    %44 = vector.load %arg5[%c0_18, %c0_19] : memref<16x1xf32, #tpu.memory_space<vmem>>, vector<16x1xf32>
    tpu.vector_store %arg5[%c0_18, %c0_19], %43 {strides = array<i32>} : memref<16x1xf32, #tpu.memory_space<vmem>>, vector<16x1xf32>,
    return
  }
  func.func @transform_0(%arg0: i32) -> (i32, i32) {
    %c0_i32 = arith.constant 0 : i32
    %c0_i32_0 = arith.constant 0 : i32
    %c0_i32_1 = arith.constant 0 : i32
    return %c0_i32, %c0_i32_0 : i32, i32
  }
  func.func @transform_1(%arg0: i32) -> (i32, i32) {
    %c0_i32 = arith.constant 0 : i32
    %c0_i32_0 = arith.constant 0 : i32
    return %arg0, %c0_i32 : i32, i32
  }
  func.func @transform_2(%arg0: i32) -> (i32, i32) {
    %c0_i32 = arith.constant 0 : i32
    %c0_i32_0 = arith.constant 0 : i32
    %c0_i32_1 = arith.constant 0 : i32
    return %c0_i32, %c0_i32_0 : i32, i32
  }
  func.func @transform_3(%arg0: i32) -> (i32, i32) {
    %c0_i32 = arith.constant 0 : i32
    %c0_i32_0 = arith.constant 0 : i32
    return %arg0, %c0_i32 : i32, i32
  }
  func.func @transform_4(%arg0: i32) -> (i32, i32) {
    %c0_i32 = arith.constant 0 : i32
    %c0_i32_0 = arith.constant 0 : i32
    return %arg0, %c0_i32 : i32, i32
  }
}

module attributes {stable_mosaic.version = 11 : i64} {
  func.func @_supcon_resident_kernel(%arg0: i32, %arg1: memref<16x32xbf16, #tpu.memory_space<vmem>>, %arg2: memref<16x1xi32, #tpu.memory_space<vmem>>, %arg3: memref<1x16xi32, #tpu.memory_space<vmem>>, %arg4: memref<16x1xf32, #tpu.memory_space<vmem>>, %arg5: memref<16x1xf32, #tpu.memory_space<vmem>>) attributes {dimension_semantics = [#tpu.dimension_semantics<parallel>], iteration_bounds = array<i64: 1>, scalar_prefetch = 0 : i64, scratch_operands = 0 : i64, tpu.core_type = #tpu.core_type<tc>, window_params = [{pipeline_mode = #tpu.pipeline_mode<synchronous>, transform_indices = @transform_0, window_bounds = array<i64: 16, 32>}, {transform_indices = @transform_1, window_bounds = array<i64: 16, 1>}, {pipeline_mode = #tpu.pipeline_mode<synchronous>, transform_indices = @transform_2, window_bounds = array<i64: 1, 16>}, {transform_indices = @transform_3, window_bounds = array<i64: 16, 1>}, {transform_indices = @transform_4, window_bounds = array<i64: 16, 1>}]} {
    %c16_i32 = arith.constant 16 : i32
    %0 = arith.muli %arg0, %c16_i32 : i32
    %1 = tpu.assume_multiple %0, 16 : i32
    %2 = arith.index_cast %1 : i32 to index
    %c0 = arith.constant 0 : index
    %3 = vector.load %arg1[%2, %c0] : memref<16x32xbf16, #tpu.memory_space<vmem>>, vector<16x32xbf16>
    %cst = arith.constant 1.431250e+01 : bf16
    %4 = vector.broadcast %cst : bf16 to vector<16x32xbf16>
    %5 = arith.mulf %3, %4 : vector<16x32xbf16>
    %c0_0 = arith.constant 0 : index
    %c0_1 = arith.constant 0 : index
    %6 = vector.load %arg1[%c0_0, %c0_1] : memref<16x32xbf16, #tpu.memory_space<vmem>>, vector<16x32xbf16>
    %cst_2 = arith.constant dense<0.000000e+00> : vector<16x16xf32>
    %7 = tpu.matmul %5, %6, %cst_2 {dimension_numbers = #tpu.dot_dimension_numbers<[1], [1], [0], [0], [0, 0, 1, 0], [], []>} : vector<16x32xbf16>, vector<16x32xbf16>, vector<16x16xf32> -> vector<16x16xf32>
    %c16_i32_3 = arith.constant 16 : i32
    %8 = arith.muli %arg0, %c16_i32_3 : i32
    %9 = tpu.iota {dimensions = array<i32: 0>} : vector<16x1xi32>
    %10 = vector.broadcast %8 : i32 to vector<16x1xi32>
    %11 = arith.addi %10, %9 : vector<16x1xi32>
    %12 = tpu.iota {dimensions = array<i32: 1>} : vector<16x16xi32>
    %13 = vector.broadcast %11 : vector<16x1xi32> to vector<16x16xi32>
    %14 = arith.cmpi eq, %12, %13 : vector<16x16xi32>
    %c0_4 = arith.constant 0 : index
    %c0_5 = arith.constant 0 : index
    %15 = vector.load %arg2[%c0_4, %c0_5] : memref<16x1xi32, #tpu.memory_space<vmem>>, vector<16x1xi32>
    %c0_6 = arith.constant 0 : index
    %c0_7 = arith.constant 0 : index
    %16 = vector.load %arg3[%c0_6, %c0_7] : memref<1x16xi32, #tpu.memory_space<vmem>>, vector<1x16xi32>
    %17 = vector.broadcast %15 : vector<16x1xi32> to vector<16x16xi32>
    %18 = vector.broadcast %16 : vector<1x16xi32> to vector<16x16xi32>
    %19 = arith.cmpi eq, %17, %18 : vector<16x16xi32>
    %cst_8 = arith.constant dense<true> : vector<16x16xi1>
    %20 = arith.xori %14, %cst_8 : vector<16x16xi1>
    %21 = arith.andi %19, %20 : vector<16x16xi1>
    %cst_9 = arith.constant dense<0xFF800000> : vector<16xf32>
    %22 = vector.multi_reduction <maximumf>, %7, %cst_9 [1] : vector<16x16xf32> to vector<16xf32>
    %23 = vector.shape_cast %22 : vector<16xf32> to vector<16x1xf32>
    %24 = vector.broadcast %23 : vector<16x1xf32> to vector<16x16xf32>
    %25 = arith.subf %7, %24 : vector<16x16xf32>
    %26 = math.exp %25 : vector<16x16xf32>
    %cst_10 = arith.constant 0.000000e+00 : f32
    %27 = vector.broadcast %cst_10 : f32 to vector<16x16xf32>
    %28 = arith.select %14, %27, %26 : vector<16x16xi1>, vector<16x16xf32>
    %cst_11 = arith.constant dense<0.000000e+00> : vector<16xf32>
    %29 = vector.multi_reduction <add>, %28, %cst_11 [1] : vector<16x16xf32> to vector<16xf32>
    %30 = vector.shape_cast %29 : vector<16xf32> to vector<16x1xf32>
    %31 = math.log %30 : vector<16x1xf32>
    %cst_12 = arith.constant 0.000000e+00 : f32
    %32 = vector.broadcast %cst_12 : f32 to vector<16x16xf32>
    %33 = arith.select %21, %25, %32 : vector<16x16xi1>, vector<16x16xf32>
    %cst_13 = arith.constant dense<0.000000e+00> : vector<16xf32>
    %34 = vector.multi_reduction <add>, %33, %cst_13 [1] : vector<16x16xf32> to vector<16xf32>
    %35 = vector.shape_cast %34 : vector<16xf32> to vector<16x1xf32>
    %c0_14 = arith.constant 0 : index
    %c0_15 = arith.constant 0 : index
    %36 = vector.load %arg4[%c0_14, %c0_15] : memref<16x1xf32, #tpu.memory_space<vmem>>, vector<16x1xf32>
    %37 = arith.mulf %36, %31 : vector<16x1xf32>
    %38 = arith.subf %35, %37 : vector<16x1xf32>
    %cst_16 = arith.constant -1.000000e+00 : f32
    %39 = vector.broadcast %cst_16 : f32 to vector<16x1xf32>
    %40 = arith.mulf %39, %38 : vector<16x1xf32>
    %cst_17 = arith.constant 1.000000e+00 : f32
    %41 = vector.broadcast %cst_17 : f32 to vector<16x1xf32>
    %42 = arith.maximumf %36, %41 : vector<16x1xf32>
    %43 = arith.divf %40, %42 : vector<16x1xf32>
    %c0_18 = arith.constant 0 : index
    %c0_19 = arith.constant 0 : index
    %44 = vector.load %arg5[%c0_18, %c0_19] : memref<16x1xf32, #tpu.memory_space<vmem>>, vector<16x1xf32>
    tpu.vector_store %arg5[%c0_18, %c0_19], %43 {strides = array<i32>} : memref<16x1xf32, #tpu.memory_space<vmem>>, vector<16x1xf32>,
    return
  }
  func.func @transform_0(%arg0: i32) -> (i32, i32) {
    %c0_i32 = arith.constant 0 : i32
    %c0_i32_0 = arith.constant 0 : i32
    %c0_i32_1 = arith.constant 0 : i32
    return %c0_i32, %c0_i32_0 : i32, i32
  }
  func.func @transform_1(%arg0: i32) -> (i32, i32) {
    %c0_i32 = arith.constant 0 : i32
    %c0_i32_0 = arith.constant 0 : i32
    return %arg0, %c0_i32 : i32, i32
  }
  func.func @transform_2(%arg0: i32) -> (i32, i32) {
    %c0_i32 = arith.constant 0 : i32
    %c0_i32_0 = arith.constant 0 : i32
    %c0_i32_1 = arith.constant 0 : i32
    return %c0_i32, %c0_i32_0 : i32, i32
  }
  func.func @transform_3(%arg0: i32) -> (i32, i32) {
    %c0_i32 = arith.constant 0 : i32
    %c0_i32_0 = arith.constant 0 : i32
    return %arg0, %c0_i32 : i32, i32
  }
  func.func @transform_4(%arg0: i32) -> (i32, i32) {
    %c0_i32 = arith.constant 0 : i32
    %c0_i32_0 = arith.constant 0 : i32
    return %arg0, %c0_i32 : i32, i32
  }
}

</mosaic_0001>

<bundles_post_ra>
// kernel: tpu_custom_call.1
= control target key start
LH: loop header
LB: loop body
LE: loop exit
PB: predicated region body
PF: predicated region fallthrough
CT: control target
= control target key end

     0   :  { %vm37_vm0 = vcmask 261120   ;;  %v193_v8 = vmov 0   ;;  %vm84_vm1 = vcmask 130048   ;;  %v58_v15 = vlaneseq  ;;  %s257_s0 = inlined_call_operand.vmem [shape: bf16[16,32], index: 0, kind: input, shape index: {}]   ;;  %s258_s2 = inlined_call_operand.vmem [shape: s32[1,16], index: 2, kind: input, shape index: {}]   ;;  %s259_s1 = inlined_call_operand.vmem [shape: s32[16,1], index: 1, kind: input, shape index: {}]   ;;  %s260_s3 = inlined_call_operand.vmem [shape: f32[16,1], index: 3, kind: input, shape index: {}]   ;;  %s261_s4 = inlined_call_operand.vmem [shape: f32[16,1], index: 4, kind: output, shape index: {}]  }
   0x1   :  { %v173_v0 = vld [vmem:[%s257_s0] sm:$0xff]   ;;  %178 = vset.pattern.permute.xlu1 %v193_v8  ;;  %179 = vset.pattern.permute.xlu0 %v193_v8  ;;  %v69_v10 = vld [vmem:[%s259_s1 + $0x8] sm:$0xff]  ;;  %vm194_vm3 = vmmov 1  }
   0x2   :  { %v171_v1 = vld [vmem:[%s257_s0] sm:$0xff]  ;;  %v174_v2 = vunpack.c.l.bf16 %v173_v0  ;;  %v175_v3 = vunpack.c.h.bf16 %v173_v0  ;;  %v59_v16 = vshrl.u32 %v58_v15, 7  ;;  %v65_v17 = vand.u32 127, %v58_v15  ;;  %v118_v40 = vld [vmem:[%s260_s3 + $0x8] sm:$0xff] }
   0x3   :  { %v42_v4 = vsel %vm37_vm0, %v171_v1, 0  ;;  %v68_v9 = vld [vmem:[%s259_s1] sm:$0xff]  ;;  %v126_v41 = vmax.f32 %v118_v40, 1.0 }
   0x4   :  { %51 = vmatpush.bf16.xpose.msra.mxu0 %v42_v4  ;;  %v27_v5 = vmul.f32 14.3125, %v174_v2  ;;  %v28_v6 = vmul.f32 14.3125, %v175_v3  ;;  %72 = vperm.xlu1 %178, %v68_v9   ;;  %v180_v19 = vld [vmem:[%s258_s2] ss:$0 sm:$0xff]  ;;  %vm66_vm2 = vcmp.eq.s32.totalorder %v65_v17, %v59_v16  ;;  %v60_v20 = vadd.s32 8, %v59_v16 }
   0x5   :  { %vm80_vm4 = vmxor %vm66_vm2, %vm194_vm3  ;;  %v117_v38 = vld [vmem:[%s260_s3] sm:$0xff]  ;;  %vm147_vm15 = vweird.f32 %v126_v41  ;;  %v153_v63 = vand.u32 2147483648, %v126_v41  ;;  %v151_v2 = vand.u32 2147483647, %v126_v41 }
   0x6   :  { %v29_v7 = vpack.c.bf16 %v28_v6, %v27_v5  ;;  %vm67_vm7 = vcmp.eq.s32.totalorder %v65_v17, %v60_v20  ;;  %v125_v39 = vmax.f32 %v117_v38, 1.0 }
   0x7   :  { %vm81_vm8 = vmxor %vm67_vm7, %vm194_vm3  ;;  %v154_v6 = vor.u32 1.1754944e-38, %v153_v63  ;;  %vm152_vm3 = vcmp.eq.f32.partialorder %v151_v2, 8.507059e+37 }
   0x8   :  { %vm132_vm11 = vweird.f32 %v125_v39  ;;  %v138_v49 = vand.u32 2147483648, %v125_v39  ;;  %v136_v51 = vand.u32 2147483647, %v125_v39 }
   0xa   :  { %v139_v56 = vor.u32 1.1754944e-38, %v138_v49  ;;  %vm137_vm14 = vcmp.eq.f32.partialorder %v136_v51, 8.507059e+37 }
   0xb   :  { %170 = vmatmul.msk.bf16.vlgmr.msra.gmra.mxu0 %vm37_vm0, %v29_v7 }
   0xc   :  { %75 = vperm.xlu1 %178, %v69_v10  }
  0x76   :  { %v73_v18 = vpop.permute.xlu1 %72 }
  0x77   :  { %vm78_vm5 = vcmp.eq.s32.totalorder %v73_v18, %v180_v19 }
  0x78   :  { %vm82_vm6 = vmand %vm78_vm5, %vm80_vm4 }
  0x7e   :  { %v76_v23 = vpop.permute.xlu1 %75 }
  0x7f   :  { %vm79_vm9 = vcmp.eq.s32.totalorder %v76_v23, %v180_v19 }
  0x80   :  { %vm83_vm10 = vmand %vm79_vm9, %vm81_vm8 }
  0x88   :  { %v53_v11 = vpop.f32.mrf.mxu0 }
  0x89   :  { %v85_v12 = vsel %vm84_vm1, %v53_v11, -inf }
  0x8a   :  { %86 = vmax.xlane.f32.xlu0 %v85_v12 }
  0x90   :  { %v55_v13 = vpop.f32.mrf.mxu0 }
  0x91   :  { %v88_v14 = vsel %vm84_vm1, %v55_v13, -inf }
  0x92   :  { %89 = vmax.xlane.f32.xlu0 %v88_v14 }
  0xfd   :  { %v87_v21 = vpop.xlane.xlu0 %86 }
  0xfe   :  { %v91_v22 = vsub.f32 %v53_v11, %v87_v21 }
 0x100   :  { %v93_v24 = vmul.f32 1.442695, %v91_v22  ;;  %v109_v25 = vsel %vm82_vm6, %v91_v22, 0.0 }
 0x101   :  { %v111_v26 = vsel %vm84_vm1, %v109_v25, 0.0 }
 0x102   :  { %181 = vpow2.f32 %v93_v24  ;;  %112 = vadd.xlane.f32.xlu0 %v111_v26 }
 0x105   :  { %v90_v27 = vpop.xlane.xlu0 %89 }
 0x106   :  { %v92_v28 = vsub.f32 %v55_v13, %v90_v27 }
 0x108   :  { %v182_v29 = vpop.eup %181  ;;  %v95_v30 = vmul.f32 1.442695, %v92_v28  ;;  %v110_v31 = vsel %vm83_vm10, %v92_v28, 0.0 }
 0x109   :  { %v114_v32 = vsel %vm84_vm1, %v110_v31, 0.0  ;;  %v97_v33 = vsel %vm66_vm2, 0.0, %v182_v29 }
 0x10a   :  { %183 = vpow2.f32 %v95_v30  ;;  %115 = vadd.xlane.f32.xlu1 %v114_v32  ;;  %v99_v34 = vsel %vm84_vm1, %v97_v33, 0.0 }
 0x10b   :  { %100 = vadd.xlane.f32.xlu2 %v99_v34  ;;  %185 = vrcp.f32 %v125_v39 }
 0x10c   :  { %187 = vrcp.f32 %v126_v41 }
 0x110   :  { %v184_v35 = vpop.eup %183 }
 0x111   :  { %v98_v36 = vsel %vm67_vm7, 0.0, %v184_v35  ;;  %v186_v42 = vpop.eup %185 }
 0x112   :  { %v102_v37 = vsel %vm84_vm1, %v98_v36, 0.0  ;;  %v128_v43 = vmul.f32 %v186_v42, %v125_v39  ;;  %v188_v45 = vpop.eup %187  ;;  %vm133_vm12 = vweird.f32 %v186_v42  ;;  %vm157_vm1 = vcmask 7168  }
 0x113   :  { %103 = vadd.xlane.f32.xlu2 %v102_v37  ;;  %v143_v48 = vmul.f32 %v188_v45, %v126_v41  ;;  %vm134_vm13 = vmor %vm132_vm11, %vm133_vm12  ;;  %vm148_vm0 = vweird.f32 %v188_v45 }
 0x114   :  { %v129_v44 = vsub.f32 1.0, %v128_v43  ;;  %vm149_vm2 = vmor %vm147_vm15, %vm148_vm0 }
 0x115   :  { %v144_v52 = vsub.f32 1.0, %v143_v48 }
 0x116   :  { %v130_v47 = vmul.f32 %v186_v42, %v129_v44 }
 0x117   :  { %v145_v59 = vmul.f32 %v188_v45, %v144_v52 }
 0x118   :  { %v131_v50 = vadd.f32 %v186_v42, %v130_v47 }
 0x119   :  { %v146_v1 = vadd.f32 %v188_v45, %v145_v59 }
 0x11a   :  { %v135_v57 = vsel %vm134_vm13, %v186_v42, %v131_v50 }
 0x11b   :  { %v140_v62 = vsel %vm137_vm14, %v139_v56, %v135_v57  ;;  %v150_v7 = vsel %vm149_vm2, %v188_v45, %v146_v1 }
 0x11c   :  { %v155_v11 = vsel %vm152_vm3, %v154_v6, %v150_v7 }
 0x175   :  { %v113_v60 = vpop.xlane.xlu0 %112 }
 0x17d   :  { %v116_v9 = vpop.xlane.xlu1 %115 }
 0x17e   :  { %v101_v46 = vpop.xlane.xlu2 %100 }
 0x17f   :  { %189 = vlog2.f32 %v101_v46 }
 0x185   :  { %v190_v53 = vpop.eup %189 }
 0x186   :  { %v106_v54 = vmul.f32 0.6931472, %v190_v53  ;;  %v104_v55 = vpop.xlane.xlu2 %103 }
 0x187   :  { %191 = vlog2.f32 %v104_v55 }
 0x188   :  { %v119_v58 = vmul.f32 %v117_v38, %v106_v54 }
 0x18a   :  { %v121_v61 = vsub.f32 %v113_v60, %v119_v58 }
 0x18c   :  { %v123_v0 = vmul.f32 -1.0, %v121_v61 }
 0x18d   :  { %v192_v3 = vpop.eup %191 }
 0x18e   :  { %v141_v4 = vmul.f32 %v140_v62, %v123_v0  ;;  %v108_v5 = vmul.f32 0.6931472, %v192_v3 }
 0x190   :  { %158 = vst.msk [vmem:[%s261_s4] sm:$0xff] %vm157_vm1, %v141_v4  ;;  %v120_v8 = vmul.f32 %v118_v40, %v108_v5 }
 0x192   :  { %v122_v10 = vsub.f32 %v116_v9, %v120_v8 }
 0x194   :  { %v124_v12 = vmul.f32 -1.0, %v122_v10 }
 0x196   :  { %v156_v13 = vmul.f32 %v155_v11, %v124_v12 }
 0x198   :  { %159 = vst.msk [vmem:[%s261_s4 + $0x8] sm:$0xff] %vm157_vm1, %v156_v13 }

// kernel: tpu_custom_call.1
= control target key start
LH: loop header
LB: loop body
LE: loop exit
PB: predicated region body
PF: predicated region fallthrough
CT: control target
= control target key end

     0   :  { %vm37_vm0 = vcmask 261120   ;;  %v193_v8 = vmov 0   ;;  %vm84_vm1 = vcmask 130048   ;;  %v58_v15 = vlaneseq  ;;  %s257_s0 = inlined_call_operand.vmem [shape: bf16[16,32], index: 0, kind: input, shape index: {}]   ;;  %s258_s2 = inlined_call_operand.vmem [shape: s32[1,16], index: 2, kind: input, shape index: {}]   ;;  %s259_s1 = inlined_call_operand.vmem [shape: s32[16,1], index: 1, kind: input, shape index: {}]   ;;  %s260_s3 = inlined_call_operand.vmem [shape: f32[16,1], index: 3, kind: input, shape index: {}]   ;;  %s261_s4 = inlined_call_operand.vmem [shape: f32[16,1], index: 4, kind: output, shape index: {}]  }
   0x1   :  { %v173_v0 = vld [vmem:[%s257_s0] sm:$0xff]   ;;  %178 = vset.pattern.permute.xlu1 %v193_v8  ;;  %179 = vset.pattern.permute.xlu0 %v193_v8  ;;  %v69_v10 = vld [vmem:[%s259_s1 + $0x8] sm:$0xff]  ;;  %vm194_vm3 = vmmov 1  }
   0x2   :  { %v171_v1 = vld [vmem:[%s257_s0] sm:$0xff]  ;;  %v174_v2 = vunpack.c.l.bf16 %v173_v0  ;;  %v175_v3 = vunpack.c.h.bf16 %v173_v0  ;;  %v59_v16 = vshrl.u32 %v58_v15, 7  ;;  %v65_v17 = vand.u32 127, %v58_v15  ;;  %v118_v40 = vld [vmem:[%s260_s3 + $0x8] sm:$0xff] }
   0x3   :  { %v42_v4 = vsel %vm37_vm0, %v171_v1, 0  ;;  %v68_v9 = vld [vmem:[%s259_s1] sm:$0xff]  ;;  %v126_v41 = vmax.f32 %v118_v40, 1.0 }
   0x4   :  { %51 = vmatpush.bf16.xpose.msra.mxu0 %v42_v4  ;;  %v27_v5 = vmul.f32 14.3125, %v174_v2  ;;  %v28_v6 = vmul.f32 14.3125, %v175_v3  ;;  %72 = vperm.xlu1 %178, %v68_v9   ;;  %v180_v19 = vld [vmem:[%s258_s2] ss:$0 sm:$0xff]  ;;  %vm66_vm2 = vcmp.eq.s32.totalorder %v65_v17, %v59_v16  ;;  %v60_v20 = vadd.s32 8, %v59_v16 }
   0x5   :  { %vm80_vm4 = vmxor %vm66_vm2, %vm194_vm3  ;;  %v117_v38 = vld [vmem:[%s260_s3] sm:$0xff]  ;;  %vm147_vm15 = vweird.f32 %v126_v41  ;;  %v153_v63 = vand.u32 2147483648, %v126_v41  ;;  %v151_v2 = vand.u32 2147483647, %v126_v41 }
   0x6   :  { %v29_v7 = vpack.c.bf16 %v28_v6, %v27_v5  ;;  %vm67_vm7 = vcmp.eq.s32.totalorder %v65_v17, %v60_v20  ;;  %v125_v39 = vmax.f32 %v117_v38, 1.0 }
   0x7   :  { %vm81_vm8 = vmxor %vm67_vm7, %vm194_vm3  ;;  %v154_v6 = vor.u32 1.1754944e-38, %v153_v63  ;;  %vm152_vm3 = vcmp.eq.f32.partialorder %v151_v2, 8.507059e+37 }
   0x8   :  { %vm132_vm11 = vweird.f32 %v125_v39  ;;  %v138_v49 = vand.u32 2147483648, %v125_v39  ;;  %v136_v51 = vand.u32 2147483647, %v125_v39 }
   0xa   :  { %v139_v56 = vor.u32 1.1754944e-38, %v138_v49  ;;  %vm137_vm14 = vcmp.eq.f32.partialorder %v136_v51, 8.507059e+37 }
   0xb   :  { %170 = vmatmul.msk.bf16.vlgmr.msra.gmra.mxu0 %vm37_vm0, %v29_v7 }
   0xc   :  { %75 = vperm.xlu1 %178, %v69_v10  }
  0x76   :  { %v73_v18 = vpop.permute.xlu1 %72 }
  0x77   :  { %vm78_vm5 = vcmp.eq.s32.totalorder %v73_v18, %v180_v19 }
  0x78   :  { %vm82_vm6 = vmand %vm78_vm5, %vm80_vm4 }
  0x7e   :  { %v76_v23 = vpop.permute.xlu1 %75 }
  0x7f   :  { %vm79_vm9 = vcmp.eq.s32.totalorder %v76_v23, %v180_v19 }
  0x80   :  { %vm83_vm10 = vmand %vm79_vm9, %vm81_vm8 }
  0x88   :  { %v53_v11 = vpop.f32.mrf.mxu0 }
  0x89   :  { %v85_v12 = vsel %vm84_vm1, %v53_v11, -inf }
  0x8a   :  { %86 = vmax.xlane.f32.xlu0 %v85_v12 }
  0x90   :  { %v55_v13 = vpop.f32.mrf.mxu0 }
  0x91   :  { %v88_v14 = vsel %vm84_vm1, %v55_v13, -inf }
  0x92   :  { %89 = vmax.xlane.f32.xlu0 %v88_v14 }
  0xfd   :  { %v87_v21 = vpop.xlane.xlu0 %86 }
  0xfe   :  { %v91_v22 = vsub.f32 %v53_v11, %v87_v21 }
 0x100   :  { %v93_v24 = vmul.f32 1.442695, %v91_v22  ;;  %v109_v25 = vsel %vm82_vm6, %v91_v22, 0.0 }
 0x101   :  { %v111_v26 = vsel %vm84_vm1, %v109_v25, 0.0 }
 0x102   :  { %181 = vpow2.f32 %v93_v24  ;;  %112 = vadd.xlane.f32.xlu0 %v111_v26 }
 0x105   :  { %v90_v27 = vpop.xlane.xlu0 %89 }
 0x106   :  { %v92_v28 = vsub.f32 %v55_v13, %v90_v27 }
 0x108   :  { %v182_v29 = vpop.eup %181  ;;  %v95_v30 = vmul.f32 1.442695, %v92_v28  ;;  %v110_v31 = vsel %vm83_vm10, %v92_v28, 0.0 }
 0x109   :  { %v114_v32 = vsel %vm84_vm1, %v110_v31, 0.0  ;;  %v97_v33 = vsel %vm66_vm2, 0.0, %v182_v29 }
 0x10a   :  { %183 = vpow2.f32 %v95_v30  ;;  %115 = vadd.xlane.f32.xlu1 %v114_v32  ;;  %v99_v34 = vsel %vm84_vm1, %v97_v33, 0.0 }
 0x10b   :  { %100 = vadd.xlane.f32.xlu2 %v99_v34  ;;  %185 = vrcp.f32 %v125_v39 }
 0x10c   :  { %187 = vrcp.f32 %v126_v41 }
 0x110   :  { %v184_v35 = vpop.eup %183 }
 0x111   :  { %v98_v36 = vsel %vm67_vm7, 0.0, %v184_v35  ;;  %v186_v42 = vpop.eup %185 }
 0x112   :  { %v102_v37 = vsel %vm84_vm1, %v98_v36, 0.0  ;;  %v128_v43 = vmul.f32 %v186_v42, %v125_v39  ;;  %v188_v45 = vpop.eup %187  ;;  %vm133_vm12 = vweird.f32 %v186_v42  ;;  %vm157_vm1 = vcmask 7168  }
 0x113   :  { %103 = vadd.xlane.f32.xlu2 %v102_v37  ;;  %v143_v48 = vmul.f32 %v188_v45, %v126_v41  ;;  %vm134_vm13 = vmor %vm132_vm11, %vm133_vm12  ;;  %vm148_vm0 = vweird.f32 %v188_v45 }
 0x114   :  { %v129_v44 = vsub.f32 1.0, %v128_v43  ;;  %vm149_vm2 = vmor %vm147_vm15, %vm148_vm0 }
 0x115   :  { %v144_v52 = vsub.f32 1.0, %v143_v48 }
 0x116   :  { %v130_v47 = vmul.f32 %v186_v42, %v129_v44 }
 0x117   :  { %v145_v59 = vmul.f32 %v188_v45, %v144_v52 }
 0x118   :  { %v131_v50 = vadd.f32 %v186_v42, %v130_v47 }
 0x119   :  { %v146_v1 = vadd.f32 %v188_v45, %v145_v59 }
 0x11a   :  { %v135_v57 = vsel %vm134_vm13, %v186_v42, %v131_v50 }
 0x11b   :  { %v140_v62 = vsel %vm137_vm14, %v139_v56, %v135_v57  ;;  %v150_v7 = vsel %vm149_vm2, %v188_v45, %v146_v1 }
 0x11c   :  { %v155_v11 = vsel %vm152_vm3, %v154_v6, %v150_v7 }
 0x175   :  { %v113_v60 = vpop.xlane.xlu0 %112 }
 0x17d   :  { %v116_v9 = vpop.xlane.xlu1 %115 }
 0x17e   :  { %v101_v46 = vpop.xlane.xlu2 %100 }
 0x17f   :  { %189 = vlog2.f32 %v101_v46 }
 0x185   :  { %v190_v53 = vpop.eup %189 }
 0x186   :  { %v106_v54 = vmul.f32 0.6931472, %v190_v53  ;;  %v104_v55 = vpop.xlane.xlu2 %103 }
 0x187   :  { %191 = vlog2.f32 %v104_v55 }
 0x188   :  { %v119_v58 = vmul.f32 %v117_v38, %v106_v54 }
 0x18a   :  { %v121_v61 = vsub.f32 %v113_v60, %v119_v58 }
 0x18c   :  { %v123_v0 = vmul.f32 -1.0, %v121_v61 }
 0x18d   :  { %v192_v3 = vpop.eup %191 }
 0x18e   :  { %v141_v4 = vmul.f32 %v140_v62, %v123_v0  ;;  %v108_v5 = vmul.f32 0.6931472, %v192_v3 }
 0x190   :  { %158 = vst.msk [vmem:[%s261_s4] sm:$0xff] %vm157_vm1, %v141_v4  ;;  %v120_v8 = vmul.f32 %v118_v40, %v108_v5 }
 0x192   :  { %v122_v10 = vsub.f32 %v116_v9, %v120_v8 }
 0x194   :  { %v124_v12 = vmul.f32 -1.0, %v122_v10 }
 0x196   :  { %v156_v13 = vmul.f32 %v155_v11, %v124_v12 }
 0x198   :  { %159 = vst.msk [vmem:[%s261_s4 + $0x8] sm:$0xff] %vm157_vm1, %v156_v13 }

</bundles_post_ra>
